<compile_context>
chip_gen: v5e
topology: v5e:2x2
jax: 0.10.0
libtpu: 0.0.40
codegen_flags: <defaults>
</compile_context>

<pallas_src>
import jax
import jax.numpy as jnp
from jax import lax
from jax.experimental import pallas as pl
from jax.experimental.pallas import tpu as pltpu


_VMEM_LIMIT = 32 * 1024 * 1024          # fits scoped defaults on v5e/v6e/v7x
_BLOCK_TARGET_BYTES = 2 * 1024 * 1024   # per-input per-buffer streamed block
_KRON_MAX_BYTES = 4 * 1024 * 1024       # resident resize-matrix budget


# ---------------------------------------------------------------------------
# Kernels
# ---------------------------------------------------------------------------
def _accum_cc(a, b, out_ref, sim_acc, va_acc, vb_acc):
    """Per-block centered accumulation + final combine.  a, b: (G, HW) f32."""
    i = pl.program_id(0)

    @pl.when(i == 0)
    def _init():
        sim_acc[...] = jnp.zeros_like(sim_acc)
        va_acc[...] = jnp.zeros_like(va_acc)
        vb_acc[...] = jnp.zeros_like(vb_acc)

    # Per-slice means over the lane-dense HW axis.  Zero-padded slices have
    # mean 0 and centered values 0, so they contribute nothing.
    am = jnp.sum(a, axis=1, keepdims=True) * (1.0 / a.shape[1])   # (G, 1)
    bm = jnp.sum(b, axis=1, keepdims=True) * (1.0 / b.shape[1])   # (G, 1)
    ac = a - am
    bc = b - bm

    sim_acc[...] += jnp.sum(ac * bc, keepdims=True)   # (1, 1)
    va_acc[...] += jnp.sum(ac * ac, keepdims=True)
    vb_acc[...] += jnp.sum(bc * bc, keepdims=True)

    @pl.when(i == pl.num_programs(0) - 1)
    def _finalize():
        # sim / (sqrt(va)*sqrt(vb)) == sim * rsqrt(va) * rsqrt(vb)
        # (separate rsqrts avoid f32 overflow of va*vb for large tensors)
        out_ref[...] = sim_acc[...] * lax.rsqrt(va_acc[...]) * lax.rsqrt(vb_acc[...])


def _cc_pair_kernel(a_ref, b_ref, out_ref, sim_acc, va_acc, vb_acc):
    _accum_cc(a_ref[...].astype(jnp.float32),
              b_ref[...].astype(jnp.float32),
              out_ref, sim_acc, va_acc, vb_acc)


def _cc_resize_kernel(rT_ref, a_ref, b_ref, out_ref, sim_acc, va_acc, vb_acc):
    a = a_ref[...].astype(jnp.float32)                                  # (G, HaWa)
    # Bilinear resize of all G slices as one lane-dense MXU matmul.
    ar = jnp.dot(a, rT_ref[...], preferred_element_type=jnp.float32)   # (G, HbWb)
    _accum_cc(ar, b_ref[...].astype(jnp.float32),
              out_ref, sim_acc, va_acc, vb_acc)


def _cc_fusion_kernel(a_ref, b_ref, f_ref, out_ref,
                      saf, sa2, sbf, sb2, sf2):
    i = pl.program_id(0)

    @pl.when(i == 0)
    def _init():
        for r in (saf, sa2, sbf, sb2, sf2):
            r[...] = jnp.zeros_like(r)

    a = a_ref[...].astype(jnp.float32)
    b = b_ref[...].astype(jnp.float32)
    f = f_ref[...].astype(jnp.float32)
    inv = 1.0 / a.shape[1]
    am = jnp.sum(a, axis=1, keepdims=True) * inv
    bm = jnp.sum(b, axis=1, keepdims=True) * inv
    fm = jnp.sum(f, axis=1, keepdims=True) * inv
    ac, bc, fc = a - am, b - bm, f - fm

    saf[...] += jnp.sum(ac * fc, keepdims=True)
    sa2[...] += jnp.sum(ac * ac, keepdims=True)
    sbf[...] += jnp.sum(bc * fc, keepdims=True)
    sb2[...] += jnp.sum(bc * bc, keepdims=True)
    sf2[...] += jnp.sum(fc * fc, keepdims=True)

    @pl.when(i == pl.num_programs(0) - 1)
    def _finalize():
        inv_sf = lax.rsqrt(sf2[...])
        r1 = saf[...] * lax.rsqrt(sa2[...]) * inv_sf
        r2 = sbf[...] * lax.rsqrt(sb2[...]) * inv_sf
        out_ref[...] = 0.5 * (r1 + r2)


# ---------------------------------------------------------------------------
# Host-side helpers
# ---------------------------------------------------------------------------
def _bilinear_matrix(out_size, in_size):
    """(out_size, in_size) bilinear interp matrix, PyTorch align_corners=False."""
    o = jnp.arange(out_size, dtype=jnp.float32)
    src = jnp.maximum((o + 0.5) * (float(in_size) / float(out_size)) - 0.5, 0.0)
    i0 = jnp.clip(jnp.floor(src), 0, in_size - 1).astype(jnp.int32)
    i1 = jnp.minimum(i0 + 1, in_size - 1)
    lam = src - i0.astype(jnp.float32)
    w0 = (1.0 - lam)[:, None] * jax.nn.one_hot(i0, in_size, dtype=jnp.float32)
    w1 = lam[:, None] * jax.nn.one_hot(i1, in_size, dtype=jnp.float32)
    return w0 + w1


def _choose_g(nc, max_hw):
    """Slices per block: a few MiB per streamed input, 8-sublane aligned."""
    g = max(1, _BLOCK_TARGET_BYTES // (max_hw * 4))
    if g >= nc:
        return ((nc + 7) // 8) * 8        # single block covering all slices
    return max(8, (g // 8) * 8)


def _pad_slices(x2d, g):
    """Zero-pad the slice axis to a multiple of g (zero slices are inert)."""
    nc = x2d.shape[0]
    nc_pad = ((nc + g - 1) // g) * g
    if nc_pad != nc:
        x2d = jnp.pad(x2d, ((0, nc_pad - nc), (0, 0)))
    return x2d, nc_pad


def _compiler_params():
    return pltpu.CompilerParams(dimension_semantics=("arbitrary",),
                                vmem_limit_bytes=_VMEM_LIMIT)


# ---------------------------------------------------------------------------
# Pallas-backed forward pieces
# ---------------------------------------------------------------------------
def _c_cc_pair(A, B):
    """c_CC(A, B), equal spatial sizes, fused in one Pallas kernel."""
    assert A.shape == B.shape
    N, C, H, W = A.shape
    nc, hw = N * C, H * W
    a = A.reshape(nc, hw)
    b = B.reshape(nc, hw)
    g = _choose_g(nc, hw)
    a, nc_pad = _pad_slices(a, g)
    b, _ = _pad_slices(b, g)
    out = pl.pallas_call(
        _cc_pair_kernel,
        out_shape=jax.ShapeDtypeStruct((1, 1), jnp.float32),
        grid=(nc_pad // g,),
        in_specs=[pl.BlockSpec((g, hw), lambda i: (i, 0))] * 2,
        out_specs=pl.BlockSpec((1, 1), lambda i: (0, 0)),
        scratch_shapes=[pltpu.VMEM((1, 1), jnp.float32)] * 3,
        compiler_params=_compiler_params(),
    )(a, b)
    return out[0, 0]


def _c_cc_resize(A, B):
    """c_CC(interpolate(A, size=B.spatial, bilinear), B)."""
    N, C, Ha, Wa = A.shape
    _, _, Hb, Wb = B.shape
    nc = N * C
    hwa, hwb = Ha * Wa, Hb * Wb

    rh = _bilinear_matrix(Hb, Ha)    # (Hb, Ha)
    rw = _bilinear_matrix(Wb, Wa)    # (Wb, Wa)

    if hwa * hwb * 4 <= _KRON_MAX_BYTES:
        # Fused path: one lane-dense matmul per block with a resident kron matrix.
        rT = jnp.kron(rh, rw).T                     # (Ha*Wa, Hb*Wb)
        a = A.reshape(nc, hwa)
        b = B.reshape(nc, hwb)
        g = _choose_g(nc, max(hwa, hwb))
        a, nc_pad = _pad_slices(a, g)
        b, _ = _pad_slices(b, g)
        out = pl.pallas_call(
            _cc_resize_kernel,
            out_shape=jax.ShapeDtypeStruct((1, 1), jnp.float32),
            grid=(nc_pad // g,),
            in_specs=[
                pl.BlockSpec((hwa, hwb), lambda i: (0, 0)),   # resident resize matrix
                pl.BlockSpec((g, hwa), lambda i: (i, 0)),     # streamed A block
                pl.BlockSpec((g, hwb), lambda i: (i, 0)),     # streamed B block
            ],
            out_specs=pl.BlockSpec((1, 1), lambda i: (0, 0)),
            scratch_shapes=[pltpu.VMEM((1, 1), jnp.float32)] * 3,
            compiler_params=_compiler_params(),
        )(rT, a, b)
        return out[0, 0]

    # Large-spatial fallback: resize via two XLA matmuls, then fused CC kernel.
    Ar = jnp.einsum('hH,ncHW,wW->nchw', rh, A.astype(jnp.float32), rw)
    return _c_cc_pair(Ar, B)


def _c_cc_fusion(A, B, F):
    """(c_CC(A, F) + c_CC(B, F)) / 2 fused into a single Pallas kernel."""
    assert A.shape == F.shape and B.shape == F.shape
    N, C, H, W = A.shape
    nc, hw = N * C, H * W
    a = A.reshape(nc, hw)
    b = B.reshape(nc, hw)
    f = F.reshape(nc, hw)
    g = _choose_g(nc, hw)
    a, nc_pad = _pad_slices(a, g)
    b, _ = _pad_slices(b, g)
    f, _ = _pad_slices(f, g)
    out = pl.pallas_call(
        _cc_fusion_kernel,
        out_shape=jax.ShapeDtypeStruct((1, 1), jnp.float32),
        grid=(nc_pad // g,),
        in_specs=[pl.BlockSpec((g, hw), lambda i: (i, 0))] * 3,
        out_specs=pl.BlockSpec((1, 1), lambda i: (0, 0)),
        scratch_shapes=[pltpu.VMEM((1, 1), jnp.float32)] * 5,
        compiler_params=_compiler_params(),
    )(a, b, f)
    return out[0, 0]


def correlation_coefficient(A, B, Fusion=None):
    """Pallas forward of CorrelationCoefficient.forward."""
    if Fusion is None:
        return _c_cc_resize(A, B)
    return _c_cc_fusion(A, B, Fusion)


# ---------------------------------------------------------------------------
# Pure-JAX reference (independent gather-based bilinear) for verification
# ---------------------------------------------------------------------------
def _bilinear_resize_ref(x, out_h, out_w):
    N, C, H, W = x.shape

    def idx(o_sz, i_sz):
        o = jnp.arange(o_sz, dtype=jnp.float32)
        s = jnp.maximum((o + 0.5) * (float(i_sz) / float(o_sz)) - 0.5, 0.0)
        i0 = jnp.clip(jnp.floor(s), 0, i_sz - 1).astype(jnp.int32)
        i1 = jnp.minimum(i0 + 1, i_sz - 1)
        return i0, i1, s - i0.astype(jnp.float32)

    y0, y1, ly = idx(out_h, H)
    x0, x1, lx = idx(out_w, W)
    top = (x[:, :, y0, :] * (1.0 - ly)[None, None, :, None]
           + x[:, :, y1, :] * ly[None, None, :, None])
    return top[:, :, :, x0] * (1.0 - lx) + top[:, :, :, x1] * lx


def _c_cc_ref(A, B):
    Am = jnp.mean(A, axis=(2, 3), keepdims=True)
    Bm = jnp.mean(B, axis=(2, 3), keepdims=True)
    As, Bs = A - Am, B - Bm
    sim = jnp.sum(As * Bs)
    return sim / (jnp.sqrt(jnp.sum(As * As)) * jnp.sqrt(jnp.sum(Bs * Bs)))


def _reference_forward(A, B, Fusion=None):
    if Fusion is None:
        return _c_cc_ref(_bilinear_resize_ref(A, B.shape[2], B.shape[3]), B)
    return (_c_cc_ref(A, Fusion) + _c_cc_ref(B, Fusion)) / 2.0


# ---------------------------------------------------------------------------
if __name__ == "__main__":
    key = jax.random.PRNGKey(0)
    k1, k2, k3, k4, k5, k6, k7, k8 = jax.random.split(key, 8)
    N, C = 2, 4

    # Path 1: Fusion is None  (A upsampled 16x16 -> 32x32, then CC with B)
    A = jax.random.normal(k1, (N, C, 16, 16), dtype=jnp.float32)
    B = (jnp.repeat(jnp.repeat(A, 2, axis=2), 2, axis=3)
         + 0.3 * jax.random.normal(k2, (N, C, 32, 32), dtype=jnp.float32))
    out1 = jax.block_until_ready(correlation_coefficient(A, B))
    ref1 = _reference_forward(A, B)
    assert jnp.allclose(out1, ref1, rtol=1e-2, atol=1e-3), (out1, ref1)

    # Path 2: Fusion given  (average of two same-size correlations, fused kernel)
    A2 = jax.random.normal(k3, (N, C, 32, 32), dtype=jnp.float32)
    B2 = jax.random.normal(k4, (N, C, 32, 32), dtype=jnp.float32)
    Fus = 0.5 * (A2 + B2) + 0.2 * jax.random.normal(k5, (N, C, 32, 32),
                                                    dtype=jnp.float32)
    out2 = jax.block_until_ready(correlation_coefficient(A2, B2, Fusion=Fus))
    ref2 = _reference_forward(A2, B2, Fusion=Fus)
    assert jnp.allclose(out2, ref2, rtol=1e-2, atol=1e-3), (out2, ref2)

    # Path 3: Fusion path with N*C not a multiple of 8 (exercises zero-padding)
    A3 = jax.random.normal(k6, (1, 3, 16, 24), dtype=jnp.float32)
    B3 = jax.random.normal(k7, (1, 3, 16, 24), dtype=jnp.float32)
    F3 = 0.5 * (A3 + B3)
    out3 = jax.block_until_ready(correlation_coefficient(A3, B3, Fusion=F3))
    ref3 = _reference_forward(A3, B3, Fusion=F3)
    assert jnp.allclose(out3, ref3, rtol=1e-2, atol=1e-3), (out3, ref3)

    # Path 4: resize path with odd output spatial size and padded slice axis
    A4 = jax.random.normal(k8, (1, 3, 16, 16), dtype=jnp.float32)
    B4 = (jnp.repeat(jnp.repeat(A4, 2, axis=2), 2, axis=3)[:, :, :24, :24]
          + 0.25 * jax.random.normal(k2, (1, 3, 24, 24), dtype=jnp.float32))
    out4 = jax.block_until_ready(correlation_coefficient(A4, B4))
    ref4 = _reference_forward(A4, B4)
    assert jnp.allclose(out4, ref4, rtol=1e-2, atol=1e-3), (out4, ref4)

    print("KERNEL_OK")
</pallas_src>

<mosaic_0001>
module attributes {stable_mosaic.version = 11 : i64} {
  func.func @_cc_resize_kernel(%arg0: i32, %arg1: memref<256x1024xf32, #tpu.memory_space<vmem>>, %arg2: memref<8x256xf32, #tpu.memory_space<vmem>>, %arg3: memref<8x1024xf32, #tpu.memory_space<vmem>>, %arg4: memref<1x1xf32, #tpu.memory_space<vmem>>, %arg5: memref<1x1xf32, #tpu.memory_space<vmem>>, %arg6: memref<1x1xf32, #tpu.memory_space<vmem>>, %arg7: memref<1x1xf32, #tpu.memory_space<vmem>>) attributes {dimension_semantics = [#tpu.dimension_semantics<arbitrary>], iteration_bounds = array<i64: 1>, scalar_prefetch = 0 : i64, scratch_operands = 3 : i64, tpu.core_type = #tpu.core_type<tc>, window_params = [{pipeline_mode = #tpu.pipeline_mode<synchronous>, transform_indices = @transform_0, window_bounds = array<i64: 256, 1024>}, {transform_indices = @transform_1, window_bounds = array<i64: 8, 256>}, {transform_indices = @transform_2, window_bounds = array<i64: 8, 1024>}, {pipeline_mode = #tpu.pipeline_mode<synchronous>, transform_indices = @transform_3, window_bounds = array<i64: 1, 1>}]} {
    %c0 = arith.constant 0 : index
    %c0_0 = arith.constant 0 : index
    %0 = vector.load %arg2[%c0, %c0_0] : memref<8x256xf32, #tpu.memory_space<vmem>>, vector<8x256xf32>
    %c0_1 = arith.constant 0 : index
    %c0_2 = arith.constant 0 : index
    %1 = vector.load %arg1[%c0_1, %c0_2] : memref<256x1024xf32, #tpu.memory_space<vmem>>, vector<256x1024xf32>
    %cst = arith.constant dense<0.000000e+00> : vector<8x1024xf32>
    %2 = tpu.matmul %0, %1, %cst {dimension_numbers = #tpu.dot_dimension_numbers<[1], [0], [0], [1], [0, 0, 1, 1], [], []>} : vector<8x256xf32>, vector<256x1024xf32>, vector<8x1024xf32> -> vector<8x1024xf32>
    %c0_3 = arith.constant 0 : index
    %c0_4 = arith.constant 0 : index
    %3 = vector.load %arg3[%c0_3, %c0_4] : memref<8x1024xf32, #tpu.memory_space<vmem>>, vector<8x1024xf32>
    %c0_i32 = arith.constant 0 : i32
    %4 = arith.cmpi eq, %arg0, %c0_i32 : i32
    %5 = arith.extui %4 : i1 to i32
    %c0_i32_5 = arith.constant 0 : i32
    %6 = arith.cmpi ne, %5, %c0_i32_5 : i32
    scf.if %6 {
      %cst_27 = arith.constant 0.000000e+00 : f32
      %49 = vector.broadcast %cst_27 : f32 to vector<1x1xf32>
      %c0_28 = arith.constant 0 : index
      %c0_29 = arith.constant 0 : index
      %50 = vector.load %arg5[%c0_28, %c0_29] : memref<1x1xf32, #tpu.memory_space<vmem>>, vector<1x1xf32>
      tpu.vector_store %arg5[%c0_28, %c0_29], %49 {strides = array<i32>} : memref<1x1xf32, #tpu.memory_space<vmem>>, vector<1x1xf32>,
      %cst_30 = arith.constant 0.000000e+00 : f32
      %51 = vector.broadcast %cst_30 : f32 to vector<1x1xf32>
      %c0_31 = arith.constant 0 : index
      %c0_32 = arith.constant 0 : index
      %52 = vector.load %arg6[%c0_31, %c0_32] : memref<1x1xf32, #tpu.memory_space<vmem>>, vector<1x1xf32>
      tpu.vector_store %arg6[%c0_31, %c0_32], %51 {strides = array<i32>} : memref<1x1xf32, #tpu.memory_space<vmem>>, vector<1x1xf32>,
      %cst_33 = arith.constant 0.000000e+00 : f32
      %53 = vector.broadcast %cst_33 : f32 to vector<1x1xf32>
      %c0_34 = arith.constant 0 : index
      %c0_35 = arith.constant 0 : index
      %54 = vector.load %arg7[%c0_34, %c0_35] : memref<1x1xf32, #tpu.memory_space<vmem>>, vector<1x1xf32>
      tpu.vector_store %arg7[%c0_34, %c0_35], %53 {strides = array<i32>} : memref<1x1xf32, #tpu.memory_space<vmem>>, vector<1x1xf32>,
    } else {
    }
    %cst_6 = arith.constant dense<0.000000e+00> : vector<8xf32>
    %7 = vector.multi_reduction <add>, %2, %cst_6 [1] : vector<8x1024xf32> to vector<8xf32>
    %8 = vector.shape_cast %7 : vector<8xf32> to vector<8x1xf32>
    %cst_7 = arith.constant 9.765625E-4 : f32
    %9 = vector.broadcast %cst_7 : f32 to vector<8x1xf32>
    %10 = arith.mulf %8, %9 : vector<8x1xf32>
    %cst_8 = arith.constant dense<0.000000e+00> : vector<8xf32>
    %11 = vector.multi_reduction <add>, %3, %cst_8 [1] : vector<8x1024xf32> to vector<8xf32>
    %12 = vector.shape_cast %11 : vector<8xf32> to vector<8x1xf32>
    %cst_9 = arith.constant 9.765625E-4 : f32
    %13 = vector.broadcast %cst_9 : f32 to vector<8x1xf32>
    %14 = arith.mulf %12, %13 : vector<8x1xf32>
    %15 = vector.broadcast %10 : vector<8x1xf32> to vector<8x1024xf32>
    %16 = arith.subf %2, %15 : vector<8x1024xf32>
    %17 = vector.broadcast %14 : vector<8x1xf32> to vector<8x1024xf32>
    %18 = arith.subf %3, %17 : vector<8x1024xf32>
    %c0_10 = arith.constant 0 : index
    %c0_11 = arith.constant 0 : index
    %19 = vector.load %arg5[%c0_10, %c0_11] : memref<1x1xf32, #tpu.memory_space<vmem>>, vector<1x1xf32>
    %20 = arith.mulf %16, %18 : vector<8x1024xf32>
    %21 = vector.shape_cast %20 : vector<8x1024xf32> to vector<1x8x1024xf32>
    %cst_12 = arith.constant dense<0.000000e+00> : vector<1xf32>
    %22 = vector.multi_reduction <add>, %21, %cst_12 [1, 2] : vector<1x8x1024xf32> to vector<1xf32>
    %23 = vector.shape_cast %22 : vector<1xf32> to vector<1x1x1xf32>
    %24 = vector.extract %23[0, 0, 0] : f32 from vector<1x1x1xf32>
    %25 = vector.broadcast %24 : f32 to vector<1x1xf32>
    %26 = arith.addf %19, %25 : vector<1x1xf32>
    %c0_13 = arith.constant 0 : index
    %c0_14 = arith.constant 0 : index
    %27 = vector.load %arg5[%c0_13, %c0_14] : memref<1x1xf32, #tpu.memory_space<vmem>>, vector<1x1xf32>
    tpu.vector_store %arg5[%c0_13, %c0_14], %26 {strides = array<i32>} : memref<1x1xf32, #tpu.memory_space<vmem>>, vector<1x1xf32>,
    %c0_15 = arith.constant 0 : index
    %c0_16 = arith.constant 0 : index
    %28 = vector.load %arg6[%c0_15, %c0_16] : memref<1x1xf32, #tpu.memory_space<vmem>>, vector<1x1xf32>
    %29 = arith.mulf %16, %16 : vector<8x1024xf32>
    %30 = vector.shape_cast %29 : vector<8x1024xf32> to vector<1x8x1024xf32>
    %cst_17 = arith.constant dense<0.000000e+00> : vector<1xf32>
    %31 = vector.multi_reduction <add>, %30, %cst_17 [1, 2] : vector<1x8x1024xf32> to vector<1xf32>
    %32 = vector.shape_cast %31 : vector<1xf32> to vector<1x1x1xf32>
    %33 = vector.extract %32[0, 0, 0] : f32 from vector<1x1x1xf32>
    %34 = vector.broadcast %33 : f32 to vector<1x1xf32>
    %35 = arith.addf %28, %34 : vector<1x1xf32>
    %c0_18 = arith.constant 0 : index
    %c0_19 = arith.constant 0 : index
    %36 = vector.load %arg6[%c0_18, %c0_19] : memref<1x1xf32, #tpu.memory_space<vmem>>, vector<1x1xf32>
    tpu.vector_store %arg6[%c0_18, %c0_19], %35 {strides = array<i32>} : memref<1x1xf32, #tpu.memory_space<vmem>>, vector<1x1xf32>,
    %c0_20 = arith.constant 0 : index
    %c0_21 = arith.constant 0 : index
    %37 = vector.load %arg7[%c0_20, %c0_21] : memref<1x1xf32, #tpu.memory_space<vmem>>, vector<1x1xf32>
    %38 = arith.mulf %18, %18 : vector<8x1024xf32>
    %39 = vector.shape_cast %38 : vector<8x1024xf32> to vector<1x8x1024xf32>
    %cst_22 = arith.constant dense<0.000000e+00> : vector<1xf32>
    %40 = vector.multi_reduction <add>, %39, %cst_22 [1, 2] : vector<1x8x1024xf32> to vector<1xf32>
    %41 = vector.shape_cast %40 : vector<1xf32> to vector<1x1x1xf32>
    %42 = vector.extract %41[0, 0, 0] : f32 from vector<1x1x1xf32>
    %43 = vector.broadcast %42 : f32 to vector<1x1xf32>
    %44 = arith.addf %37, %43 : vector<1x1xf32>
    %c0_23 = arith.constant 0 : index
    %c0_24 = arith.constant 0 : index
    %45 = vector.load %arg7[%c0_23, %c0_24] : memref<1x1xf32, #tpu.memory_space<vmem>>, vector<1x1xf32>
    tpu.vector_store %arg7[%c0_23, %c0_24], %44 {strides = array<i32>} : memref<1x1xf32, #tpu.memory_space<vmem>>, vector<1x1xf32>,
    %c0_i32_25 = arith.constant 0 : i32
    %46 = arith.cmpi eq, %arg0, %c0_i32_25 : i32
    %47 = arith.extui %46 : i1 to i32
    %c0_i32_26 = arith.constant 0 : i32
    %48 = arith.cmpi ne, %47, %c0_i32_26 : i32
    scf.if %48 {
      %c0_27 = arith.constant 0 : index
      %c0_28 = arith.constant 0 : index
      %49 = vector.load %arg5[%c0_27, %c0_28] : memref<1x1xf32, #tpu.memory_space<vmem>>, vector<1x1xf32>
      %c0_29 = arith.constant 0 : index
      %c0_30 = arith.constant 0 : index
      %50 = vector.load %arg6[%c0_29, %c0_30] : memref<1x1xf32, #tpu.memory_space<vmem>>, vector<1x1xf32>
      %51 = math.rsqrt %50 : vector<1x1xf32>
      %52 = arith.mulf %49, %51 : vector<1x1xf32>
      %c0_31 = arith.constant 0 : index
      %c0_32 = arith.constant 0 : index
      %53 = vector.load %arg7[%c0_31, %c0_32] : memref<1x1xf32, #tpu.memory_space<vmem>>, vector<1x1xf32>
      %54 = math.rsqrt %53 : vector<1x1xf32>
      %55 = arith.mulf %52, %54 : vector<1x1xf32>
      %c0_33 = arith.constant 0 : index
      %c0_34 = arith.constant 0 : index
      %56 = vector.load %arg4[%c0_33, %c0_34] : memref<1x1xf32, #tpu.memory_space<vmem>>, vector<1x1xf32>
      tpu.vector_store %arg4[%c0_33, %c0_34], %55 {strides = array<i32>} : memref<1x1xf32, #tpu.memory_space<vmem>>, vector<1x1xf32>,
    } else {
    }
    return
  }
  func.func @transform_0(%arg0: i32) -> (i32, i32) {
    %c0_i32 = arith.constant 0 : i32
    %c0_i32_0 = arith.constant 0 : i32
    %c0_i32_1 = arith.constant 0 : i32
    return %c0_i32, %c0_i32_0 : i32, i32
  }
  func.func @transform_1(%arg0: i32) -> (i32, i32) {
    %c0_i32 = arith.constant 0 : i32
    %c0_i32_0 = arith.constant 0 : i32
    return %arg0, %c0_i32 : i32, i32
  }
  func.func @transform_2(%arg0: i32) -> (i32, i32) {
    %c0_i32 = arith.constant 0 : i32
    %c0_i32_0 = arith.constant 0 : i32
    return %arg0, %c0_i32 : i32, i32
  }
  func.func @transform_3(%arg0: i32) -> (i32, i32) {
    %c0_i32 = arith.constant 0 : i32
    %c0_i32_0 = arith.constant 0 : i32
    %c0_i32_1 = arith.constant 0 : i32
    return %c0_i32, %c0_i32_0 : i32, i32
  }
}

</mosaic_0001>

<bundles_post_ra>
// kernel: tpu_custom_call.1
= control target key start
LH: loop header
LB: loop body
LE: loop exit
PB: predicated region body
PF: predicated region fallthrough
CT: control target
= control target key end

     0   :  { %8 = vsyncpa [#allocation6], 0  ;;  %s1005_s0 = inlined_call_operand.hbm [shape: f32[256,1024], index: 0, kind: input, shape index: {}]   ;;  %s1006_s1 = inlined_call_operand.hbm [shape: f32[8,256], index: 1, kind: input, shape index: {}]   ;;  %s1007_s2 = inlined_call_operand.hbm [shape: f32[8,1024], index: 2, kind: input, shape index: {}]   ;;  %s1008_s3 = inlined_call_operand.hbm [shape: f32[1,1], index: 3, kind: output, shape index: {}]  }
   0x1   :  { %9 = vsyncpa [#allocation9], 0  ;;  %s29_s14 = sshll.u32 %s1006_s1, 4  ;;  %s30_s14 = int_to_ptr.hbm [resolvable:$true] %s29_s14 }
   0x2   :  { %10 = vsyncpa [#allocation7], 0  ;;  %s939_s15 = smov [#allocation8]   ;;  %s15_s19 = sshll.u32 %s1005_s0, 4  ;;  %s16_s19 = int_to_ptr.hbm [resolvable:$true] %s15_s19 }
   0x3   :  { %s31_s16 = sshll.u32 %s939_s15, 4  ;;  %s940_s20 = smov [#allocation5]   ;;  %s32_s16 = int_to_ptr.vmem [resolvable:$true] %s31_s16 }
   0x4   :  { %34 = dma.hbm_to_vmem [thread:$0]  %s30_s14, 256, %s32_s16, [#allocation9]  }
   0x5   :  { %s17_s21 = sshll.u32 %s940_s20, 4  ;;  %s941_s22 = smov 1024   ;;  %s18_s21 = int_to_ptr.vmem [resolvable:$true] %s17_s21 }
   0x6   :  { %s942_s23 = smov 64   ;;  %s40_s1 = sshll.u32 %s1007_s2, 4  ;;  %s41_s1 = int_to_ptr.hbm [resolvable:$true] %s40_s1 }
   0x7   :  { %23 = dma.hbm_to_vmem [thread:$0]  %s16_s19, 32768, %s18_s21, [#allocation6], %s941_s22, %s941_s22, %s942_s23  }
   0x8   :  { %s943_s26 = smov [#allocation10]  }
   0x9   :  { %s42_s27 = sshll.u32 %s943_s26, 4  ;;  %s43_s27 = int_to_ptr.vmem [resolvable:$true] %s42_s27 }
   0xa   :  { %45 = dma.hbm_to_vmem [thread:$0]  %s41_s1, 1024, %s43_s27, [#allocation9]  }
   0xb   :  { %933 = dma.done.wait [#allocation6], 32768  }
   0xc   :  { %934 = vsyncadd [#allocation6], 4294934528 }
   0xd   :  { %935 = dma.done.wait [#allocation9], 1280  }
   0xe   :  { %936 = vsyncadd [#allocation9], 4294966016  ;;  %v180_v0 = vld [vmem:[#allocation5 + $0x3c0] sm:$0xff]  ;;  %v181_v2 = vld [vmem:[#allocation5 + $0x3c8] sm:$0xff]  ;;  %vm648_vm0 = vcmask 0   ;;  %s945_s29 = smov [#allocation11]  }
   0xf   :  { %v308_v1 = vld [vmem:[#allocation5 + $0x7c0] sm:$0xff]  ;;  %316 = vmatpush.msra.mxu0 %v180_v0  ;;  %v309_v3 = vld [vmem:[#allocation5 + $0x7c8] sm:$0xff]  ;;  %356 = vmatpush.msra.mxu2 %v181_v2  ;;  %v182_v0 = vld [vmem:[#allocation5 + $0x3d0] sm:$0xff]  ;;  %s807_s30 = sshll.u32 %s945_s29, 4  ;;  %s809_s6 = sshll.u32 %s1008_s3, 4  ;;  %s808_s30 = int_to_ptr.vmem [resolvable:$true] %s807_s30  ;;  %s810_s6 = int_to_ptr.hbm [resolvable:$true] %s809_s6 }
  0x10   :  { %336 = vmatpush.msra.mxu1 %v308_v1  ;;  %v172_v4 = vld [vmem:[#allocation5 + $0x380] sm:$0xff]  ;;  %376 = vmatpush.msra.mxu3 %v309_v3  ;;  %v173_v6 = vld [vmem:[#allocation5 + $0x388] sm:$0xff]  ;;  %v310_v1 = vld [vmem:[#allocation5 + $0x7d0] sm:$0xff] }
  0x11   :  { %v300_v5 = vld [vmem:[#allocation5 + $0x780] sm:$0xff]  ;;  %v301_v7 = vld [vmem:[#allocation5 + $0x788] sm:$0xff]  ;;  %317 = vmatpush.msra.mxu0 %v172_v4  ;;  %357 = vmatpush.msra.mxu2 %v173_v6  ;;  %v183_v2 = vld [vmem:[#allocation5 + $0x3d8] sm:$0xff] }
  0x12   :  { %v164_v8 = vld [vmem:[#allocation5 + $0x340] sm:$0xff]  ;;  %337 = vmatpush.msra.mxu1 %v300_v5  ;;  %v165_v10 = vld [vmem:[#allocation5 + $0x348] sm:$0xff]  ;;  %377 = vmatpush.msra.mxu3 %v301_v7  ;;  %v311_v3 = vld [vmem:[#allocation5 + $0x7d8] sm:$0xff] }
  0x13   :  { %v292_v9 = vld [vmem:[#allocation5 + $0x740] sm:$0xff]  ;;  %v293_v11 = vld [vmem:[#allocation5 + $0x748] sm:$0xff]  ;;  %318 = vmatpush.msra.mxu0 %v164_v8  ;;  %358 = vmatpush.msra.mxu2 %v165_v10  ;;  %v174_v4 = vld [vmem:[#allocation5 + $0x390] sm:$0xff] }
  0x14   :  { %v156_v12 = vld [vmem:[#allocation5 + $0x300] sm:$0xff]  ;;  %338 = vmatpush.msra.mxu1 %v292_v9  ;;  %v157_v14 = vld [vmem:[#allocation5 + $0x308] sm:$0xff]  ;;  %378 = vmatpush.msra.mxu3 %v293_v11  ;;  %v302_v5 = vld [vmem:[#allocation5 + $0x790] sm:$0xff] }
  0x15   :  { %v284_v13 = vld [vmem:[#allocation5 + $0x700] sm:$0xff]  ;;  %v285_v15 = vld [vmem:[#allocation5 + $0x708] sm:$0xff]  ;;  %319 = vmatpush.msra.mxu0 %v156_v12  ;;  %359 = vmatpush.msra.mxu2 %v157_v14  ;;  %v175_v6 = vld [vmem:[#allocation5 + $0x398] sm:$0xff] }
  0x16   :  { %v148_v16 = vld [vmem:[#allocation5 + $0x2c0] sm:$0xff]  ;;  %339 = vmatpush.msra.mxu1 %v284_v13  ;;  %v149_v18 = vld [vmem:[#allocation5 + $0x2c8] sm:$0xff]  ;;  %379 = vmatpush.msra.mxu3 %v285_v15  ;;  %v303_v7 = vld [vmem:[#allocation5 + $0x798] sm:$0xff] }
  0x17   :  { %v276_v17 = vld [vmem:[#allocation5 + $0x6c0] sm:$0xff]  ;;  %v277_v19 = vld [vmem:[#allocation5 + $0x6c8] sm:$0xff]  ;;  %320 = vmatpush.msra.mxu0 %v148_v16  ;;  %360 = vmatpush.msra.mxu2 %v149_v18  ;;  %v166_v8 = vld [vmem:[#allocation5 + $0x350] sm:$0xff] }
  0x18   :  { %v140_v20 = vld [vmem:[#allocation5 + $0x280] sm:$0xff]  ;;  %340 = vmatpush.msra.mxu1 %v276_v17  ;;  %v141_v22 = vld [vmem:[#allocation5 + $0x288] sm:$0xff]  ;;  %380 = vmatpush.msra.mxu3 %v277_v19  ;;  %v294_v9 = vld [vmem:[#allocation5 + $0x750] sm:$0xff] }
  0x19   :  { %v268_v21 = vld [vmem:[#allocation5 + $0x680] sm:$0xff]  ;;  %v269_v23 = vld [vmem:[#allocation5 + $0x688] sm:$0xff]  ;;  %321 = vmatpush.msra.mxu0 %v140_v20  ;;  %361 = vmatpush.msra.mxu2 %v141_v22  ;;  %v167_v10 = vld [vmem:[#allocation5 + $0x358] sm:$0xff] }
  0x1a   :  { %v132_v24 = vld [vmem:[#allocation5 + $0x240] sm:$0xff]  ;;  %341 = vmatpush.msra.mxu1 %v268_v21  ;;  %v133_v26 = vld [vmem:[#allocation5 + $0x248] sm:$0xff]  ;;  %381 = vmatpush.msra.mxu3 %v269_v23  ;;  %v295_v11 = vld [vmem:[#allocation5 + $0x758] sm:$0xff] }
  0x1b   :  { %v260_v25 = vld [vmem:[#allocation5 + $0x640] sm:$0xff]  ;;  %v261_v27 = vld [vmem:[#allocation5 + $0x648] sm:$0xff]  ;;  %322 = vmatpush.msra.mxu0 %v132_v24  ;;  %362 = vmatpush.msra.mxu2 %v133_v26  ;;  %v158_v12 = vld [vmem:[#allocation5 + $0x310] sm:$0xff] }
  0x1c   :  { %v124_v28 = vld [vmem:[#allocation5 + $0x200] sm:$0xff]  ;;  %342 = vmatpush.msra.mxu1 %v260_v25  ;;  %v125_v30 = vld [vmem:[#allocation5 + $0x208] sm:$0xff]  ;;  %382 = vmatpush.msra.mxu3 %v261_v27  ;;  %v286_v13 = vld [vmem:[#allocation5 + $0x710] sm:$0xff] }
  0x1d   :  { %v252_v29 = vld [vmem:[#allocation5 + $0x600] sm:$0xff]  ;;  %v253_v31 = vld [vmem:[#allocation5 + $0x608] sm:$0xff]  ;;  %323 = vmatpush.msra.mxu0 %v124_v28  ;;  %363 = vmatpush.msra.mxu2 %v125_v30  ;;  %v159_v14 = vld [vmem:[#allocation5 + $0x318] sm:$0xff] }
  0x1e   :  { %v116_v32 = vld [vmem:[#allocation5 + $0x1c0] sm:$0xff]  ;;  %343 = vmatpush.msra.mxu1 %v252_v29  ;;  %v117_v34 = vld [vmem:[#allocation5 + $0x1c8] sm:$0xff]  ;;  %383 = vmatpush.msra.mxu3 %v253_v31  ;;  %v287_v15 = vld [vmem:[#allocation5 + $0x718] sm:$0xff] }
  0x1f   :  { %v244_v33 = vld [vmem:[#allocation5 + $0x5c0] sm:$0xff]  ;;  %v245_v35 = vld [vmem:[#allocation5 + $0x5c8] sm:$0xff]  ;;  %324 = vmatpush.msra.mxu0 %v116_v32  ;;  %364 = vmatpush.msra.mxu2 %v117_v34  ;;  %v150_v16 = vld [vmem:[#allocation5 + $0x2d0] sm:$0xff] }
  0x20   :  { %v108_v36 = vld [vmem:[#allocation5 + $0x180] sm:$0xff]  ;;  %344 = vmatpush.msra.mxu1 %v244_v33  ;;  %v109_v38 = vld [vmem:[#allocation5 + $0x188] sm:$0xff]  ;;  %384 = vmatpush.msra.mxu3 %v245_v35  ;;  %v278_v17 = vld [vmem:[#allocation5 + $0x6d0] sm:$0xff] }
  0x21   :  { %v236_v37 = vld [vmem:[#allocation5 + $0x580] sm:$0xff]  ;;  %v237_v39 = vld [vmem:[#allocation5 + $0x588] sm:$0xff]  ;;  %325 = vmatpush.msra.mxu0 %v108_v36  ;;  %365 = vmatpush.msra.mxu2 %v109_v38  ;;  %v151_v18 = vld [vmem:[#allocation5 + $0x2d8] sm:$0xff] }
  0x22   :  { %v100_v40 = vld [vmem:[#allocation5 + $0x140] sm:$0xff]  ;;  %345 = vmatpush.msra.mxu1 %v236_v37  ;;  %v101_v42 = vld [vmem:[#allocation5 + $0x148] sm:$0xff]  ;;  %385 = vmatpush.msra.mxu3 %v237_v39  ;;  %v279_v19 = vld [vmem:[#allocation5 + $0x6d8] sm:$0xff] }
  0x23   :  { %v228_v41 = vld [vmem:[#allocation5 + $0x540] sm:$0xff]  ;;  %v229_v43 = vld [vmem:[#allocation5 + $0x548] sm:$0xff]  ;;  %326 = vmatpush.msra.mxu0 %v100_v40  ;;  %366 = vmatpush.msra.mxu2 %v101_v42  ;;  %v142_v20 = vld [vmem:[#allocation5 + $0x290] sm:$0xff] }
  0x24   :  { %v92_v44 = vld [vmem:[#allocation5 + $0x100] sm:$0xff]  ;;  %346 = vmatpush.msra.mxu1 %v228_v41  ;;  %v93_v46 = vld [vmem:[#allocation5 + $0x108] sm:$0xff]  ;;  %386 = vmatpush.msra.mxu3 %v229_v43  ;;  %v270_v21 = vld [vmem:[#allocation5 + $0x690] sm:$0xff] }
  0x25   :  { %v220_v45 = vld [vmem:[#allocation5 + $0x500] sm:$0xff]  ;;  %v221_v47 = vld [vmem:[#allocation5 + $0x508] sm:$0xff]  ;;  %327 = vmatpush.msra.mxu0 %v92_v44  ;;  %367 = vmatpush.msra.mxu2 %v93_v46  ;;  %v143_v22 = vld [vmem:[#allocation5 + $0x298] sm:$0xff] }
  0x26   :  { %v84_v48 = vld [vmem:[#allocation5 + $0xc0] sm:$0xff]  ;;  %347 = vmatpush.msra.mxu1 %v220_v45  ;;  %v85_v50 = vld [vmem:[#allocation5 + $0xc8] sm:$0xff]  ;;  %387 = vmatpush.msra.mxu3 %v221_v47  ;;  %v271_v23 = vld [vmem:[#allocation5 + $0x698] sm:$0xff] }
  0x27   :  { %v212_v49 = vld [vmem:[#allocation5 + $0x4c0] sm:$0xff]  ;;  %v213_v51 = vld [vmem:[#allocation5 + $0x4c8] sm:$0xff]  ;;  %328 = vmatpush.msra.mxu0 %v84_v48  ;;  %368 = vmatpush.msra.mxu2 %v85_v50  ;;  %v134_v24 = vld [vmem:[#allocation5 + $0x250] sm:$0xff] }
  0x28   :  { %v76_v52 = vld [vmem:[#allocation5 + $0x80] sm:$0xff]  ;;  %348 = vmatpush.msra.mxu1 %v212_v49  ;;  %v77_v54 = vld [vmem:[#allocation5 + $0x88] sm:$0xff]  ;;  %388 = vmatpush.msra.mxu3 %v213_v51  ;;  %v262_v25 = vld [vmem:[#allocation5 + $0x650] sm:$0xff] }
  0x29   :  { %v204_v53 = vld [vmem:[#allocation5 + $0x480] sm:$0xff]  ;;  %v205_v55 = vld [vmem:[#allocation5 + $0x488] sm:$0xff]  ;;  %329 = vmatpush.msra.mxu0 %v76_v52  ;;  %369 = vmatpush.msra.mxu2 %v77_v54  ;;  %v135_v26 = vld [vmem:[#allocation5 + $0x258] sm:$0xff] }
  0x2a   :  { %v68_v56 = vld [vmem:[#allocation5 + $0x40] sm:$0xff]  ;;  %349 = vmatpush.msra.mxu1 %v204_v53  ;;  %v69_v58 = vld [vmem:[#allocation5 + $0x48] sm:$0xff]  ;;  %389 = vmatpush.msra.mxu3 %v205_v55  ;;  %v263_v27 = vld [vmem:[#allocation5 + $0x658] sm:$0xff] }
  0x2b   :  { %v196_v57 = vld [vmem:[#allocation5 + $0x440] sm:$0xff]  ;;  %v197_v59 = vld [vmem:[#allocation5 + $0x448] sm:$0xff]  ;;  %330 = vmatpush.msra.mxu0 %v68_v56  ;;  %370 = vmatpush.msra.mxu2 %v69_v58  ;;  %v126_v28 = vld [vmem:[#allocation5 + $0x210] sm:$0xff] }
  0x2c   :  { %v60_v60 = vld [vmem:[#allocation5] sm:$0xff]  ;;  %350 = vmatpush.msra.mxu1 %v196_v57  ;;  %v61_v62 = vld [vmem:[#allocation5 + $0x8] sm:$0xff]  ;;  %390 = vmatpush.msra.mxu3 %v197_v59  ;;  %v254_v29 = vld [vmem:[#allocation5 + $0x610] sm:$0xff] }
  0x2d   :  { %v188_v61 = vld [vmem:[#allocation5 + $0x400] sm:$0xff]  ;;  %v189_v63 = vld [vmem:[#allocation5 + $0x408] sm:$0xff]  ;;  %331 = vmatpush.msra.mxu0 %v60_v60  ;;  %371 = vmatpush.msra.mxu2 %v61_v62  ;;  %v127_v30 = vld [vmem:[#allocation5 + $0x218] sm:$0xff] }
  0x2e   :  { %351 = vmatpush.msra.mxu1 %v188_v61  ;;  %391 = vmatpush.msra.mxu3 %v189_v63  ;;  %v255_v31 = vld [vmem:[#allocation5 + $0x618] sm:$0xff]  ;;  %v118_v32 = vld [vmem:[#allocation5 + $0x1d0] sm:$0xff]  ;;  %v975_v52 = vld [vmem:[#allocation8] sm:$0xff] }
  0x2f   :  { %396 = vmatpush.msrb.mxu0 %v182_v0  ;;  %436 = vmatpush.msrb.mxu2 %v183_v2  ;;  %v246_v33 = vld [vmem:[#allocation5 + $0x5d0] sm:$0xff]  ;;  %v119_v34 = vld [vmem:[#allocation5 + $0x1d8] sm:$0xff]  ;;  %v977_v53 = vld [vmem:[#allocation8 + $0x8] sm:$0xff] }
  0x30   :  { %416 = vmatpush.msrb.mxu1 %v310_v1  ;;  %456 = vmatpush.msrb.mxu3 %v311_v3  ;;  %v247_v35 = vld [vmem:[#allocation5 + $0x5d8] sm:$0xff]  ;;  %v110_v36 = vld [vmem:[#allocation5 + $0x190] sm:$0xff]  ;;  %v184_v2 = vld [vmem:[#allocation5 + $0x3e0] sm:$0xff] }
  0x31   :  { %397 = vmatpush.msrb.mxu0 %v174_v4  ;;  %437 = vmatpush.msrb.mxu2 %v175_v6  ;;  %v238_v37 = vld [vmem:[#allocation5 + $0x590] sm:$0xff]  ;;  %v111_v38 = vld [vmem:[#allocation5 + $0x198] sm:$0xff]  ;;  %v312_v3 = vld [vmem:[#allocation5 + $0x7e0] sm:$0xff] }
  0x32   :  { %417 = vmatpush.msrb.mxu1 %v302_v5  ;;  %457 = vmatpush.msrb.mxu3 %v303_v7  ;;  %v239_v39 = vld [vmem:[#allocation5 + $0x598] sm:$0xff]  ;;  %v102_v40 = vld [vmem:[#allocation5 + $0x150] sm:$0xff]  ;;  %v185_v4 = vld [vmem:[#allocation5 + $0x3e8] sm:$0xff] }
  0x33   :  { %398 = vmatpush.msrb.mxu0 %v166_v8  ;;  %438 = vmatpush.msrb.mxu2 %v167_v10  ;;  %v230_v41 = vld [vmem:[#allocation5 + $0x550] sm:$0xff]  ;;  %v103_v42 = vld [vmem:[#allocation5 + $0x158] sm:$0xff]  ;;  %v313_v5 = vld [vmem:[#allocation5 + $0x7e8] sm:$0xff] }
  0x34   :  { %418 = vmatpush.msrb.mxu1 %v294_v9  ;;  %458 = vmatpush.msrb.mxu3 %v295_v11  ;;  %v231_v43 = vld [vmem:[#allocation5 + $0x558] sm:$0xff]  ;;  %v94_v44 = vld [vmem:[#allocation5 + $0x110] sm:$0xff]  ;;  %v176_v6 = vld [vmem:[#allocation5 + $0x3a0] sm:$0xff] }
  0x35   :  { %399 = vmatpush.msrb.mxu0 %v158_v12  ;;  %439 = vmatpush.msrb.mxu2 %v159_v14  ;;  %v222_v45 = vld [vmem:[#allocation5 + $0x510] sm:$0xff]  ;;  %v95_v46 = vld [vmem:[#allocation5 + $0x118] sm:$0xff]  ;;  %v304_v7 = vld [vmem:[#allocation5 + $0x7a0] sm:$0xff] }
  0x36   :  { %419 = vmatpush.msrb.mxu1 %v286_v13  ;;  %459 = vmatpush.msrb.mxu3 %v287_v15  ;;  %v223_v47 = vld [vmem:[#allocation5 + $0x518] sm:$0xff]  ;;  %v86_v48 = vld [vmem:[#allocation5 + $0xd0] sm:$0xff]  ;;  %v177_v8 = vld [vmem:[#allocation5 + $0x3a8] sm:$0xff] }
  0x37   :  { %400 = vmatpush.msrb.mxu0 %v150_v16  ;;  %440 = vmatpush.msrb.mxu2 %v151_v18  ;;  %v214_v49 = vld [vmem:[#allocation5 + $0x4d0] sm:$0xff]  ;;  %v87_v50 = vld [vmem:[#allocation5 + $0xd8] sm:$0xff]  ;;  %v305_v9 = vld [vmem:[#allocation5 + $0x7a8] sm:$0xff] }
  0x38   :  { %420 = vmatpush.msrb.mxu1 %v278_v17  ;;  %460 = vmatpush.msrb.mxu3 %v279_v19  ;;  %v215_v51 = vld [vmem:[#allocation5 + $0x4d8] sm:$0xff]  ;;  %v78_v54 = vld [vmem:[#allocation5 + $0x90] sm:$0xff]  ;;  %v168_v10 = vld [vmem:[#allocation5 + $0x360] sm:$0xff] }
  0x39   :  { %401 = vmatpush.msrb.mxu0 %v142_v20  ;;  %441 = vmatpush.msrb.mxu2 %v143_v22  ;;  %v206_v55 = vld [vmem:[#allocation5 + $0x490] sm:$0xff]  ;;  %v79_v56 = vld [vmem:[#allocation5 + $0x98] sm:$0xff]  ;;  %v296_v11 = vld [vmem:[#allocation5 + $0x760] sm:$0xff] }
  0x3a   :  { %421 = vmatpush.msrb.mxu1 %v270_v21  ;;  %461 = vmatpush.msrb.mxu3 %v271_v23  ;;  %v207_v57 = vld [vmem:[#allocation5 + $0x498] sm:$0xff]  ;;  %v70_v58 = vld [vmem:[#allocation5 + $0x50] sm:$0xff]  ;;  %v169_v12 = vld [vmem:[#allocation5 + $0x368] sm:$0xff] }
  0x3b   :  { %402 = vmatpush.msrb.mxu0 %v134_v24  ;;  %442 = vmatpush.msrb.mxu2 %v135_v26  ;;  %v198_v59 = vld [vmem:[#allocation5 + $0x450] sm:$0xff]  ;;  %v71_v60 = vld [vmem:[#allocation5 + $0x58] sm:$0xff]  ;;  %v297_v13 = vld [vmem:[#allocation5 + $0x768] sm:$0xff] }
  0x3c   :  { %422 = vmatpush.msrb.mxu1 %v262_v25  ;;  %462 = vmatpush.msrb.mxu3 %v263_v27  ;;  %v199_v61 = vld [vmem:[#allocation5 + $0x458] sm:$0xff]  ;;  %v62_v62 = vld [vmem:[#allocation5 + $0x10] sm:$0xff]  ;;  %v160_v14 = vld [vmem:[#allocation5 + $0x320] sm:$0xff] }
  0x3d   :  { %403 = vmatpush.msrb.mxu0 %v126_v28  ;;  %443 = vmatpush.msrb.mxu2 %v127_v30  ;;  %v190_v63 = vld [vmem:[#allocation5 + $0x410] sm:$0xff]  ;;  %v63_v0 = vld [vmem:[#allocation5 + $0x18] sm:$0xff]  ;;  %v288_v15 = vld [vmem:[#allocation5 + $0x720] sm:$0xff] }
  0x3e   :  { %423 = vmatpush.msrb.mxu1 %v254_v29  ;;  %463 = vmatpush.msrb.mxu3 %v255_v31  ;;  %v191_v1 = vld [vmem:[#allocation5 + $0x418] sm:$0xff]  ;;  %v161_v16 = vld [vmem:[#allocation5 + $0x328] sm:$0xff]  ;;  %v152_v18 = vld [vmem:[#allocation5 + $0x2e0] sm:$0xff] }
  0x3f   :  { %404 = vmatpush.msrb.mxu0 %v118_v32  ;;  %444 = vmatpush.msrb.mxu2 %v119_v34  ;;  %v289_v17 = vld [vmem:[#allocation5 + $0x728] sm:$0xff]  ;;  %v280_v19 = vld [vmem:[#allocation5 + $0x6e0] sm:$0xff] }
  0x40   :  { %424 = vmatpush.msrb.mxu1 %v246_v33  ;;  %464 = vmatpush.msrb.mxu3 %v247_v35  ;;  %v153_v20 = vld [vmem:[#allocation5 + $0x2e8] sm:$0xff]  ;;  %v144_v22 = vld [vmem:[#allocation5 + $0x2a0] sm:$0xff] }
  0x41   :  { %405 = vmatpush.msrb.mxu0 %v110_v36  ;;  %445 = vmatpush.msrb.mxu2 %v111_v38  ;;  %v281_v21 = vld [vmem:[#allocation5 + $0x6e8] sm:$0xff]  ;;  %v272_v23 = vld [vmem:[#allocation5 + $0x6a0] sm:$0xff] }
  0x42   :  { %425 = vmatpush.msrb.mxu1 %v238_v37  ;;  %465 = vmatpush.msrb.mxu3 %v239_v39  ;;  %v145_v24 = vld [vmem:[#allocation5 + $0x2a8] sm:$0xff]  ;;  %v136_v26 = vld [vmem:[#allocation5 + $0x260] sm:$0xff] }
  0x43   :  { %406 = vmatpush.msrb.mxu0 %v102_v40  ;;  %446 = vmatpush.msrb.mxu2 %v103_v42  ;;  %v273_v25 = vld [vmem:[#allocation5 + $0x6a8] sm:$0xff]  ;;  %v264_v27 = vld [vmem:[#allocation5 + $0x660] sm:$0xff] }
  0x44   :  { %426 = vmatpush.msrb.mxu1 %v230_v41  ;;  %466 = vmatpush.msrb.mxu3 %v231_v43  ;;  %v137_v28 = vld [vmem:[#allocation5 + $0x268] sm:$0xff]  ;;  %v128_v30 = vld [vmem:[#allocation5 + $0x220] sm:$0xff] }
  0x45   :  { %407 = vmatpush.msrb.mxu0 %v94_v44  ;;  %447 = vmatpush.msrb.mxu2 %v95_v46  ;;  %v265_v29 = vld [vmem:[#allocation5 + $0x668] sm:$0xff]  ;;  %v256_v31 = vld [vmem:[#allocation5 + $0x620] sm:$0xff] }
  0x46   :  { %427 = vmatpush.msrb.mxu1 %v222_v45  ;;  %467 = vmatpush.msrb.mxu3 %v223_v47  ;;  %v129_v32 = vld [vmem:[#allocation5 + $0x228] sm:$0xff]  ;;  %v120_v34 = vld [vmem:[#allocation5 + $0x1e0] sm:$0xff] }
  0x47   :  { %408 = vmatpush.msrb.mxu0 %v86_v48  ;;  %448 = vmatpush.msrb.mxu2 %v87_v50  ;;  %v257_v33 = vld [vmem:[#allocation5 + $0x628] sm:$0xff]  ;;  %v248_v35 = vld [vmem:[#allocation5 + $0x5e0] sm:$0xff] }
  0x48   :  { %428 = vmatpush.msrb.mxu1 %v214_v49  ;;  %468 = vmatpush.msrb.mxu3 %v215_v51  ;;  %v121_v36 = vld [vmem:[#allocation5 + $0x1e8] sm:$0xff]  ;;  %v112_v38 = vld [vmem:[#allocation5 + $0x1a0] sm:$0xff] }
  0x49   :  { %372 = vmatmul.f32.vlgmr.msra.gmra.mxu2 %v975_v52  ;;  %392 = vmatmul.f32.vlgmr.msra.gmra.mxu3 %v977_v53  ;;  %v249_v37 = vld [vmem:[#allocation5 + $0x5e8] sm:$0xff]  ;;  %v240_v39 = vld [vmem:[#allocation5 + $0x5a0] sm:$0xff] }
  0x4a   :  { %409 = vmatpush.msrb.mxu0 %v78_v54  ;;  %429 = vmatpush.msrb.mxu1 %v206_v55  ;;  %v113_v40 = vld [vmem:[#allocation5 + $0x1a8] sm:$0xff]  ;;  %v104_v42 = vld [vmem:[#allocation5 + $0x160] sm:$0xff] }
  0x4b   :  { %449 = vmatpush.msrb.mxu2 %v79_v56  ;;  %469 = vmatpush.msrb.mxu3 %v207_v57  ;;  %v241_v41 = vld [vmem:[#allocation5 + $0x5a8] sm:$0xff]  ;;  %v232_v43 = vld [vmem:[#allocation5 + $0x560] sm:$0xff] }
  0x4c   :  { %410 = vmatpush.msrb.mxu0 %v70_v58  ;;  %430 = vmatpush.msrb.mxu1 %v198_v59  ;;  %v105_v44 = vld [vmem:[#allocation5 + $0x168] sm:$0xff]  ;;  %v96_v46 = vld [vmem:[#allocation5 + $0x120] sm:$0xff] }
  0x4d   :  { %450 = vmatpush.msrb.mxu2 %v71_v60  ;;  %470 = vmatpush.msrb.mxu3 %v199_v61  ;;  %v233_v45 = vld [vmem:[#allocation5 + $0x568] sm:$0xff]  ;;  %v224_v47 = vld [vmem:[#allocation5 + $0x520] sm:$0xff] }
  0x4e   :  { %332 = vmatmul.f32.vlgmr.msra.gmra.mxu0 %v975_v52  ;;  %352 = vmatmul.f32.vlgmr.msra.gmra.mxu1 %v977_v53  ;;  %v97_v48 = vld [vmem:[#allocation5 + $0x128] sm:$0xff]  ;;  %v88_v50 = vld [vmem:[#allocation5 + $0xe0] sm:$0xff] }
  0x4f   :  { %411 = vmatpush.msrb.mxu0 %v62_v62  ;;  %431 = vmatpush.msrb.mxu1 %v190_v63  ;;  %v225_v49 = vld [vmem:[#allocation5 + $0x528] sm:$0xff]  ;;  %v216_v51 = vld [vmem:[#allocation5 + $0x4e0] sm:$0xff] }
  0x50   :  { %451 = vmatpush.msrb.mxu2 %v63_v0  ;;  %471 = vmatpush.msrb.mxu3 %v191_v1  ;;  %v89_v54 = vld [vmem:[#allocation5 + $0xe8] sm:$0xff]  ;;  %v80_v56 = vld [vmem:[#allocation5 + $0xa0] sm:$0xff] }
  0x51   :  { %476 = vmatpush.msra.mxu0 %v184_v2  ;;  %496 = vmatpush.msra.mxu1 %v312_v3  ;;  %v217_v55 = vld [vmem:[#allocation5 + $0x4e8] sm:$0xff]  ;;  %v208_v57 = vld [vmem:[#allocation5 + $0x4a0] sm:$0xff] }
  0x52   :  { %516 = vmatpush.msra.mxu2 %v185_v4  ;;  %536 = vmatpush.msra.mxu3 %v313_v5  ;;  %v81_v58 = vld [vmem:[#allocation5 + $0xa8] sm:$0xff]  ;;  %v72_v60 = vld [vmem:[#allocation5 + $0x60] sm:$0xff]  ;;  %v186_v4 = vld [vmem:[#allocation5 + $0x3f0] sm:$0xff] }
  0x53   :  { %452 = vmatmul.f32.vlgmr.msrb.gmra.mxu2 %v975_v52  ;;  %472 = vmatmul.f32.vlgmr.msrb.gmra.mxu3 %v977_v53  ;;  %v209_v59 = vld [vmem:[#allocation5 + $0x4a8] sm:$0xff]  ;;  %v200_v61 = vld [vmem:[#allocation5 + $0x460] sm:$0xff]  ;;  %v314_v5 = vld [vmem:[#allocation5 + $0x7f0] sm:$0xff] }
  0x54   :  { %477 = vmatpush.msra.mxu0 %v176_v6  ;;  %497 = vmatpush.msra.mxu1 %v304_v7  ;;  %v73_v62 = vld [vmem:[#allocation5 + $0x68] sm:$0xff]  ;;  %v64_v0 = vld [vmem:[#allocation5 + $0x20] sm:$0xff]  ;;  %v187_v6 = vld [vmem:[#allocation5 + $0x3f8] sm:$0xff] }
  0x55   :  { %517 = vmatpush.msra.mxu2 %v177_v8  ;;  %537 = vmatpush.msra.mxu3 %v305_v9  ;;  %v201_v63 = vld [vmem:[#allocation5 + $0x468] sm:$0xff]  ;;  %v192_v1 = vld [vmem:[#allocation5 + $0x420] sm:$0xff]  ;;  %v315_v7 = vld [vmem:[#allocation5 + $0x7f8] sm:$0xff] }
  0x56   :  { %478 = vmatpush.msra.mxu0 %v168_v10  ;;  %498 = vmatpush.msra.mxu1 %v296_v11  ;;  %v65_v2 = vld [vmem:[#allocation5 + $0x28] sm:$0xff]  ;;  %v178_v8 = vld [vmem:[#allocation5 + $0x3b0] sm:$0xff]  ;;  %v179_v10 = vld [vmem:[#allocation5 + $0x3b8] sm:$0xff] }
  0x57   :  { %518 = vmatpush.msra.mxu2 %v169_v12  ;;  %538 = vmatpush.msra.mxu3 %v297_v13  ;;  %v193_v3 = vld [vmem:[#allocation5 + $0x428] sm:$0xff]  ;;  %v306_v9 = vld [vmem:[#allocation5 + $0x7b0] sm:$0xff]  ;;  %v307_v11 = vld [vmem:[#allocation5 + $0x7b8] sm:$0xff] }
  0x58   :  { %412 = vmatmul.f32.vlgmr.msrb.gmra.mxu0 %v975_v52  ;;  %432 = vmatmul.f32.vlgmr.msrb.gmra.mxu1 %v977_v53  ;;  %v170_v12 = vld [vmem:[#allocation5 + $0x370] sm:$0xff] }
  0x59   :  { %479 = vmatpush.msra.mxu0 %v160_v14  ;;  %499 = vmatpush.msra.mxu1 %v288_v15  ;;  %v298_v13 = vld [vmem:[#allocation5 + $0x770] sm:$0xff]  ;;  %v171_v14 = vld [vmem:[#allocation5 + $0x378] sm:$0xff] }
  0x5a   :  { %519 = vmatpush.msra.mxu2 %v161_v16  ;;  %539 = vmatpush.msra.mxu3 %v289_v17  ;;  %v299_v15 = vld [vmem:[#allocation5 + $0x778] sm:$0xff]  ;;  %v162_v16 = vld [vmem:[#allocation5 + $0x330] sm:$0xff] }
  0x5b   :  { %480 = vmatpush.msra.mxu0 %v152_v18  ;;  %500 = vmatpush.msra.mxu1 %v280_v19  ;;  %v290_v17 = vld [vmem:[#allocation5 + $0x730] sm:$0xff]  ;;  %v163_v18 = vld [vmem:[#allocation5 + $0x338] sm:$0xff] }
  0x5c   :  { %520 = vmatpush.msra.mxu2 %v153_v20  ;;  %540 = vmatpush.msra.mxu3 %v281_v21  ;;  %v291_v19 = vld [vmem:[#allocation5 + $0x738] sm:$0xff]  ;;  %v154_v20 = vld [vmem:[#allocation5 + $0x2f0] sm:$0xff] }
  0x5d   :  { %481 = vmatpush.msra.mxu0 %v144_v22  ;;  %501 = vmatpush.msra.mxu1 %v272_v23  ;;  %v282_v21 = vld [vmem:[#allocation5 + $0x6f0] sm:$0xff]  ;;  %v155_v22 = vld [vmem:[#allocation5 + $0x2f8] sm:$0xff] }
  0x5e   :  { %521 = vmatpush.msra.mxu2 %v145_v24  ;;  %541 = vmatpush.msra.mxu3 %v273_v25  ;;  %v283_v23 = vld [vmem:[#allocation5 + $0x6f8] sm:$0xff]  ;;  %v146_v24 = vld [vmem:[#allocation5 + $0x2b0] sm:$0xff] }
  0x5f   :  { %482 = vmatpush.msra.mxu0 %v136_v26  ;;  %502 = vmatpush.msra.mxu1 %v264_v27  ;;  %v274_v25 = vld [vmem:[#allocation5 + $0x6b0] sm:$0xff]  ;;  %v147_v26 = vld [vmem:[#allocation5 + $0x2b8] sm:$0xff] }
  0x60   :  { %522 = vmatpush.msra.mxu2 %v137_v28  ;;  %542 = vmatpush.msra.mxu3 %v265_v29  ;;  %v275_v27 = vld [vmem:[#allocation5 + $0x6b8] sm:$0xff]  ;;  %v138_v28 = vld [vmem:[#allocation5 + $0x270] sm:$0xff] }
  0x61   :  { %483 = vmatpush.msra.mxu0 %v128_v30  ;;  %503 = vmatpush.msra.mxu1 %v256_v31  ;;  %v266_v29 = vld [vmem:[#allocation5 + $0x670] sm:$0xff]  ;;  %v139_v30 = vld [vmem:[#allocation5 + $0x278] sm:$0xff] }
  0x62   :  { %523 = vmatpush.msra.mxu2 %v129_v32  ;;  %543 = vmatpush.msra.mxu3 %v257_v33  ;;  %v267_v31 = vld [vmem:[#allocation5 + $0x678] sm:$0xff]  ;;  %v130_v32 = vld [vmem:[#allocation5 + $0x230] sm:$0xff] }
  0x63   :  { %484 = vmatpush.msra.mxu0 %v120_v34  ;;  %504 = vmatpush.msra.mxu1 %v248_v35  ;;  %v258_v33 = vld [vmem:[#allocation5 + $0x630] sm:$0xff]  ;;  %v131_v34 = vld [vmem:[#allocation5 + $0x238] sm:$0xff] }
  0x64   :  { %524 = vmatpush.msra.mxu2 %v121_v36  ;;  %544 = vmatpush.msra.mxu3 %v249_v37  ;;  %v259_v35 = vld [vmem:[#allocation5 + $0x638] sm:$0xff]  ;;  %v122_v36 = vld [vmem:[#allocation5 + $0x1f0] sm:$0xff] }
  0x65   :  { %485 = vmatpush.msra.mxu0 %v112_v38  ;;  %505 = vmatpush.msra.mxu1 %v240_v39  ;;  %v250_v37 = vld [vmem:[#allocation5 + $0x5f0] sm:$0xff]  ;;  %v123_v38 = vld [vmem:[#allocation5 + $0x1f8] sm:$0xff] }
  0x66   :  { %525 = vmatpush.msra.mxu2 %v113_v40  ;;  %545 = vmatpush.msra.mxu3 %v241_v41  ;;  %v251_v39 = vld [vmem:[#allocation5 + $0x5f8] sm:$0xff]  ;;  %v114_v40 = vld [vmem:[#allocation5 + $0x1b0] sm:$0xff] }
  0x67   :  { %486 = vmatpush.msra.mxu0 %v104_v42  ;;  %506 = vmatpush.msra.mxu1 %v232_v43  ;;  %v242_v41 = vld [vmem:[#allocation5 + $0x5b0] sm:$0xff]  ;;  %v115_v42 = vld [vmem:[#allocation5 + $0x1b8] sm:$0xff] }
  0x68   :  { %526 = vmatpush.msra.mxu2 %v105_v44  ;;  %546 = vmatpush.msra.mxu3 %v233_v45  ;;  %v243_v43 = vld [vmem:[#allocation5 + $0x5b8] sm:$0xff]  ;;  %v106_v44 = vld [vmem:[#allocation5 + $0x170] sm:$0xff] }
  0x69   :  { %487 = vmatpush.msra.mxu0 %v96_v46  ;;  %507 = vmatpush.msra.mxu1 %v224_v47  ;;  %v234_v45 = vld [vmem:[#allocation5 + $0x570] sm:$0xff]  ;;  %v107_v46 = vld [vmem:[#allocation5 + $0x178] sm:$0xff] }
  0x6a   :  { %527 = vmatpush.msra.mxu2 %v97_v48  ;;  %547 = vmatpush.msra.mxu3 %v225_v49  ;;  %v235_v47 = vld [vmem:[#allocation5 + $0x578] sm:$0xff]  ;;  %v98_v48 = vld [vmem:[#allocation5 + $0x130] sm:$0xff] }
  0x6b   :  { %488 = vmatpush.msra.mxu0 %v88_v50  ;;  %508 = vmatpush.msra.mxu1 %v216_v51  ;;  %v226_v49 = vld [vmem:[#allocation5 + $0x530] sm:$0xff]  ;;  %v99_v50 = vld [vmem:[#allocation5 + $0x138] sm:$0xff] }
  0x6c   :  { %528 = vmatpush.msra.mxu2 %v89_v54  ;;  %548 = vmatpush.msra.mxu3 %v217_v55  ;;  %v227_v51 = vld [vmem:[#allocation5 + $0x538] sm:$0xff]  ;;  %v90_v54 = vld [vmem:[#allocation5 + $0xf0] sm:$0xff] }
  0x6d   :  { %489 = vmatpush.msra.mxu0 %v80_v56  ;;  %509 = vmatpush.msra.mxu1 %v208_v57  ;;  %v218_v55 = vld [vmem:[#allocation5 + $0x4f0] sm:$0xff]  ;;  %v91_v56 = vld [vmem:[#allocation5 + $0xf8] sm:$0xff] }
  0x6e   :  { %529 = vmatpush.msra.mxu2 %v81_v58  ;;  %549 = vmatpush.msra.mxu3 %v209_v59  ;;  %v219_v57 = vld [vmem:[#allocation5 + $0x4f8] sm:$0xff]  ;;  %v82_v58 = vld [vmem:[#allocation5 + $0xb0] sm:$0xff] }
  0x6f   :  { %490 = vmatpush.msra.mxu0 %v72_v60  ;;  %510 = vmatpush.msra.mxu1 %v200_v61  ;;  %v210_v59 = vld [vmem:[#allocation5 + $0x4b0] sm:$0xff]  ;;  %v83_v60 = vld [vmem:[#allocation5 + $0xb8] sm:$0xff] }
  0x70   :  { %530 = vmatpush.msra.mxu2 %v73_v62  ;;  %550 = vmatpush.msra.mxu3 %v201_v63  ;;  %v211_v61 = vld [vmem:[#allocation5 + $0x4b8] sm:$0xff]  ;;  %v74_v62 = vld [vmem:[#allocation5 + $0x70] sm:$0xff] }
  0x71   :  { %491 = vmatpush.msra.mxu0 %v64_v0  ;;  %511 = vmatpush.msra.mxu1 %v192_v1  ;;  %v202_v63 = vld [vmem:[#allocation5 + $0x470] sm:$0xff]  ;;  %v75_v0 = vld [vmem:[#allocation5 + $0x78] sm:$0xff] }
  0x72   :  { %531 = vmatpush.msra.mxu2 %v65_v2  ;;  %551 = vmatpush.msra.mxu3 %v193_v3  ;;  %v203_v1 = vld [vmem:[#allocation5 + $0x478] sm:$0xff]  ;;  %v66_v2 = vld [vmem:[#allocation5 + $0x30] sm:$0xff] }
  0x73   :  { %492 = vmatmul.f32.vlgmr.msra.gmra.mxu0 %v975_v52  ;;  %512 = vmatmul.f32.vlgmr.msra.gmra.mxu1 %v977_v53  ;;  %v194_v3 = vld [vmem:[#allocation5 + $0x430] sm:$0xff] }
  0x74   :  { %532 = vmatmul.f32.vlgmr.msra.gmra.mxu2 %v975_v52  ;;  %552 = vmatmul.f32.vlgmr.msra.gmra.mxu3 %v977_v53 }
  0x75   :  { %556 = vmatpush.msrb.mxu0 %v186_v4  ;;  %576 = vmatpush.msrb.mxu1 %v314_v5  ;;  %v67_v4 = vld [vmem:[#allocation5 + $0x38] sm:$0xff] }
  0x76   :  { %596 = vmatpush.msrb.mxu2 %v187_v6  ;;  %616 = vmatpush.msrb.mxu3 %v315_v7  ;;  %v195_v5 = vld [vmem:[#allocation5 + $0x438] sm:$0xff] }
  0x77   :  { %557 = vmatpush.msrb.mxu0 %v178_v8  ;;  %577 = vmatpush.msrb.mxu1 %v306_v9 }
  0x78   :  { %597 = vmatpush.msrb.mxu2 %v179_v10  ;;  %617 = vmatpush.msrb.mxu3 %v307_v11 }
  0x79   :  { %558 = vmatpush.msrb.mxu0 %v170_v12  ;;  %578 = vmatpush.msrb.mxu1 %v298_v13  ;;  %v636_v12 = vld [vmem:[#allocation10] sm:$0xff]  ;;  %v637_v13 = vld [vmem:[#allocation10 + $0x8] sm:$0xff] }
  0x7a   :  { %598 = vmatpush.msrb.mxu2 %v171_v14  ;;  %618 = vmatpush.msrb.mxu3 %v299_v15 }
  0x7b   :  { %559 = vmatpush.msrb.mxu0 %v162_v16  ;;  %579 = vmatpush.msrb.mxu1 %v290_v17 }
  0x7c   :  { %599 = vmatpush.msrb.mxu2 %v163_v18  ;;  %619 = vmatpush.msrb.mxu3 %v291_v19  ;;  %v662_v18 = vadd.f32 %v637_v13, %v636_v12 }
  0x7d   :  { %560 = vmatpush.msrb.mxu0 %v154_v20  ;;  %580 = vmatpush.msrb.mxu1 %v282_v21  ;;  %v638_v21 = vld [vmem:[#allocation10 + $0x10] sm:$0xff] }
  0x7e   :  { %600 = vmatpush.msrb.mxu2 %v155_v22  ;;  %620 = vmatpush.msrb.mxu3 %v283_v23  ;;  %v663_v23 = vadd.f32 %v662_v18, %v638_v21 }
  0x7f   :  { %561 = vmatpush.msrb.mxu0 %v146_v24  ;;  %581 = vmatpush.msrb.mxu1 %v274_v25 }
  0x80   :  { %601 = vmatpush.msrb.mxu2 %v147_v26  ;;  %621 = vmatpush.msrb.mxu3 %v275_v27 }
  0x81   :  { %562 = vmatpush.msrb.mxu0 %v138_v28  ;;  %582 = vmatpush.msrb.mxu1 %v266_v29 }
  0x82   :  { %602 = vmatpush.msrb.mxu2 %v139_v30  ;;  %622 = vmatpush.msrb.mxu3 %v267_v31 }
  0x83   :  { %563 = vmatpush.msrb.mxu0 %v130_v32  ;;  %583 = vmatpush.msrb.mxu1 %v258_v33  ;;  %v640_v32 = vld [vmem:[#allocation10 + $0x20] sm:$0xff] }
  0x84   :  { %603 = vmatpush.msrb.mxu2 %v131_v34  ;;  %623 = vmatpush.msrb.mxu3 %v259_v35 }
  0x85   :  { %564 = vmatpush.msrb.mxu0 %v122_v36  ;;  %584 = vmatpush.msrb.mxu1 %v250_v37 }
  0x86   :  { %604 = vmatpush.msrb.mxu2 %v123_v38  ;;  %624 = vmatpush.msrb.mxu3 %v251_v39  ;;  %v641_v38 = vld [vmem:[#allocation10 + $0x28] sm:$0xff] }
  0x87   :  { %565 = vmatpush.msrb.mxu0 %v114_v40  ;;  %585 = vmatpush.msrb.mxu1 %v242_v41 }
  0x88   :  { %605 = vmatpush.msrb.mxu2 %v115_v42  ;;  %625 = vmatpush.msrb.mxu3 %v243_v43 }
  0x89   :  { %566 = vmatpush.msrb.mxu0 %v106_v44  ;;  %586 = vmatpush.msrb.mxu1 %v234_v45  ;;  %v642_v45 = vld [vmem:[#allocation10 + $0x30] sm:$0xff] }
  0x8a   :  { %606 = vmatpush.msrb.mxu2 %v107_v46  ;;  %626 = vmatpush.msrb.mxu3 %v235_v47 }
  0x8b   :  { %567 = vmatpush.msrb.mxu0 %v98_v48  ;;  %587 = vmatpush.msrb.mxu1 %v226_v49  ;;  %v643_v48 = vld [vmem:[#allocation10 + $0x38] sm:$0xff] }
  0x8c   :  { %607 = vmatpush.msrb.mxu2 %v99_v50  ;;  %627 = vmatpush.msrb.mxu3 %v227_v51 }
  0x8d   :  { %568 = vmatpush.msrb.mxu0 %v90_v54  ;;  %588 = vmatpush.msrb.mxu1 %v218_v55 }
  0x8e   :  { %608 = vmatpush.msrb.mxu2 %v91_v56  ;;  %628 = vmatpush.msrb.mxu3 %v219_v57 }
  0x8f   :  { %569 = vmatpush.msrb.mxu0 %v82_v58  ;;  %589 = vmatpush.msrb.mxu1 %v210_v59 }
  0x90   :  { %609 = vmatpush.msrb.mxu2 %v83_v60  ;;  %629 = vmatpush.msrb.mxu3 %v211_v61 }
  0x91   :  { %570 = vmatpush.msrb.mxu0 %v74_v62  ;;  %590 = vmatpush.msrb.mxu1 %v202_v63 }
  0x92   :  { %610 = vmatpush.msrb.mxu2 %v75_v0  ;;  %630 = vmatpush.msrb.mxu3 %v203_v1 }
  0x93   :  { %571 = vmatpush.msrb.mxu0 %v66_v2  ;;  %591 = vmatpush.msrb.mxu1 %v194_v3 }
  0x94   :  { %611 = vmatpush.msrb.mxu2 %v67_v4  ;;  %631 = vmatpush.msrb.mxu3 %v195_v5 }
  0x95   :  { %572 = vmatmul.f32.vlgmr.msrb.gmra.mxu0 %v975_v52  ;;  %592 = vmatmul.f32.vlgmr.msrb.gmra.mxu1 %v977_v53 }
  0x96   :  { %612 = vmatmul.f32.vlgmr.msrb.gmra.mxu2 %v975_v52  ;;  %632 = vmatmul.f32.vlgmr.msrb.gmra.mxu3 %v977_v53  ;;  %v639_v53 = vld [vmem:[#allocation10 + $0x18] sm:$0xff] }
  0x97   :  { %v664_v29 = vadd.f32 %v663_v23, %v639_v53 }
  0x99   :  { %v665_v37 = vadd.f32 %v664_v29, %v640_v32 }
  0x9b   :  { %v666_v44 = vadd.f32 %v665_v37, %v641_v38 }
  0x9d   :  { %v667_v47 = vadd.f32 %v666_v44, %v642_v45 }
  0x9f   :  { %v668_v49 = vadd.f32 %v667_v47, %v643_v48 }
  0xcb   :  { %v333_v6 = vpop.f32.mrf.mxu0  ;;  %v353_v7 = vpop.f32.mrf.mxu1 }
  0xcc   :  { %v373_v8 = vpop.f32.mrf.mxu2  ;;  %v393_v9 = vpop.f32.mrf.mxu3  ;;  %v354_v14 = vadd.f32 %v353_v7, %v333_v6 }
  0xcd   :  { %v394_v15 = vadd.f32 %v393_v9, %v373_v8 }
  0xcf   :  { %v652_v22 = vadd.f32 %v394_v15, %v354_v14 }
  0xd5   :  { %v413_v10 = vpop.f32.mrf.mxu0  ;;  %v433_v11 = vpop.f32.mrf.mxu1 }
  0xd6   :  { %v453_v16 = vpop.f32.mrf.mxu2  ;;  %v473_v17 = vpop.f32.mrf.mxu3  ;;  %v434_v52 = vadd.f32 %v433_v11, %v413_v10 }
  0xd7   :  { %v474_v25 = vadd.f32 %v473_v17, %v453_v16 }
  0xd8   :  { %v653_v24 = vadd.f32 %v652_v22, %v434_v52 }
  0xda   :  { %v654_v33 = vadd.f32 %v653_v24, %v474_v25 }
  0xf0   :  { %v493_v19 = vpop.f32.mrf.mxu0  ;;  %v513_v20 = vpop.f32.mrf.mxu1 }
  0xf1   :  { %v514_v28 = vadd.f32 %v513_v20, %v493_v19 }
  0xf3   :  { %v655_v35 = vadd.f32 %v654_v33, %v514_v28 }
  0xf7   :  { %v533_v26 = vpop.f32.mrf.mxu2  ;;  %v553_v27 = vpop.f32.mrf.mxu3 }
  0xf8   :  { %v554_v34 = vadd.f32 %v553_v27, %v533_v26 }
  0xfa   :  { %v656_v39 = vadd.f32 %v655_v35, %v554_v34 }
 0x112   :  { %v573_v30 = vpop.f32.mrf.mxu0  ;;  %v593_v31 = vpop.f32.mrf.mxu1 }
 0x113   :  { %v594_v36 = vadd.f32 %v593_v31, %v573_v30 }
 0x115   :  { %v657_v43 = vadd.f32 %v656_v39, %v594_v36 }
 0x119   :  { %v613_v40 = vpop.f32.mrf.mxu2  ;;  %v633_v41 = vpop.f32.mrf.mxu3 }
 0x11a   :  { %v634_v42 = vadd.f32 %v633_v41, %v613_v40 }
 0x11c   :  { %v658_v46 = vadd.f32 %v657_v43, %v634_v42 }
 0x11e   :  { %659 = vadd.xlane.f32.xlu0 %v658_v46 }
 0x126   :  { %669 = vadd.xlane.f32.xlu0 %v668_v49 }
 0x191   :  { %v660_v50 = vpop.xlane.xlu0 %659 }
 0x192   :  { %v661_v51 = vmul.f32 0.0009765625, %v660_v50 }
 0x194   :  { %v672_v54 = vsub.f32 %v354_v14, %v661_v51  ;;  %v673_v55 = vsub.f32 %v394_v15, %v661_v51  ;;  %v674_v60 = vsub.f32 %v434_v52, %v661_v51  ;;  %v675_v5 = vsub.f32 %v474_v25, %v661_v51 }
 0x195   :  { %v677_v24 = vsub.f32 %v554_v34, %v661_v51  ;;  %v678_v30 = vsub.f32 %v594_v36, %v661_v51 }
 0x196   :  { %v718_v57 = vmul.f32 %v672_v54, %v672_v54  ;;  %v719_v58 = vmul.f32 %v673_v55, %v673_v55  ;;  %v720_v6 = vmul.f32 %v674_v60, %v674_v60  ;;  %v721_v19 = vmul.f32 %v675_v5, %v675_v5 }
 0x197   :  { %v723_v34 = vmul.f32 %v677_v24, %v677_v24  ;;  %v724_v36 = vmul.f32 %v678_v30, %v678_v30 }
 0x198   :  { %v726_v0 = vadd.f32 %v719_v58, %v718_v57 }
 0x199   :  { %v670_v56 = vpop.xlane.xlu0 %669 }
 0x19a   :  { %v671_v59 = vmul.f32 0.0009765625, %v670_v56  ;;  %v727_v14 = vadd.f32 %v726_v0, %v720_v6 }
 0x19c   :  { %v680_v61 = vsub.f32 %v636_v12, %v671_v59  ;;  %v681_v62 = vsub.f32 %v637_v13, %v671_v59  ;;  %v682_v63 = vsub.f32 %v638_v21, %v671_v59  ;;  %v683_v1 = vsub.f32 %v639_v53, %v671_v59 }
 0x19d   :  { %v684_v4 = vsub.f32 %v640_v32, %v671_v59  ;;  %v685_v11 = vsub.f32 %v641_v38, %v671_v59  ;;  %v686_v12 = vsub.f32 %v642_v45, %v671_v59  ;;  %v676_v13 = vsub.f32 %v514_v28, %v661_v51 }
 0x19e   :  { %v746_v2 = vmul.f32 %v680_v61, %v680_v61  ;;  %v747_v3 = vmul.f32 %v681_v62, %v681_v62  ;;  %v748_v7 = vmul.f32 %v682_v63, %v682_v63  ;;  %v689_v9 = vmul.f32 %v680_v61, %v672_v54 }
 0x19f   :  { %v690_v10 = vmul.f32 %v681_v62, %v673_v55  ;;  %v749_v15 = vmul.f32 %v683_v1, %v683_v1  ;;  %v691_v17 = vmul.f32 %v682_v63, %v674_v60  ;;  %v750_v20 = vmul.f32 %v684_v4, %v684_v4 }
 0x1a0   :  { %v754_v8 = vadd.f32 %v747_v3, %v746_v2  ;;  %v692_v22 = vmul.f32 %v683_v1, %v675_v5  ;;  %v687_v23 = vsub.f32 %v643_v48, %v671_v59  ;;  %v751_v53 = vmul.f32 %v685_v11, %v685_v11 }
 0x1a1   :  { %v697_v18 = vadd.f32 %v690_v10, %v689_v9  ;;  %v693_v26 = vmul.f32 %v684_v4, %v676_v13  ;;  %v728_v29 = vadd.f32 %v727_v14, %v721_v19  ;;  %v722_v31 = vmul.f32 %v676_v13, %v676_v13 }
 0x1a2   :  { %v755_v16 = vadd.f32 %v754_v8, %v748_v7  ;;  %v752_v32 = vmul.f32 %v686_v12, %v686_v12  ;;  %v694_v35 = vmul.f32 %v685_v11, %v677_v24  ;;  %v753_v38 = vmul.f32 %v687_v23, %v687_v23 }
 0x1a3   :  { %v698_v52 = vadd.f32 %v697_v18, %v691_v17  ;;  %v679_v28 = vsub.f32 %v634_v42, %v661_v51  ;;  %v695_v40 = vmul.f32 %v686_v12, %v678_v30  ;;  %v729_v43 = vadd.f32 %v728_v29, %v722_v31 }
 0x1a4   :  { %v756_v21 = vadd.f32 %v755_v16, %v749_v15  ;;  %v944_v55 = vmov 0.0  }
 0x1a5   :  { %v699_v27 = vadd.f32 %v698_v52, %v692_v22  ;;  %v696_v45 = vmul.f32 %v687_v23, %v679_v28  ;;  %v730_v48 = vadd.f32 %v729_v43, %v723_v34  ;;  %v725_v50 = vmul.f32 %v679_v28, %v679_v28  ;;  %649 = vst.msk [vmem:[#allocation2] sm:$0x1] %vm648_vm0, %v944_v55 }
 0x1a6   :  { %v757_v25 = vadd.f32 %v756_v21, %v750_v20  ;;  %650 = vst.msk [vmem:[#allocation3] sm:$0x1] %vm648_vm0, %v944_v55 }
 0x1a7   :  { %v700_v37 = vadd.f32 %v699_v27, %v693_v26  ;;  %v731_v49 = vadd.f32 %v730_v48, %v724_v36  ;;  %651 = vst.msk [vmem:[#allocation4] sm:$0x1] %vm648_vm0, %v944_v55 }
 0x1a8   :  { %v758_v33 = vadd.f32 %v757_v25, %v751_v53 }
 0x1a9   :  { %v701_v41 = vadd.f32 %v700_v37, %v694_v35  ;;  %v732_v54 = vadd.f32 %v731_v49, %v725_v50 }
 0x1aa   :  { %v759_v39 = vadd.f32 %v758_v33, %v752_v32 }
 0x1ab   :  { %v702_v46 = vadd.f32 %v701_v41, %v695_v40 }
 0x1ac   :  { %v760_v44 = vadd.f32 %v759_v39, %v753_v38  ;;  %v688_v11 = vld [vmem:[#allocation2] sm:$0x1] }
 0x1ad   :  { %v703_v47 = vadd.f32 %v702_v46, %v696_v45  ;;  %v717_v16 = vld [vmem:[#allocation3] sm:$0x1] }
 0x1ae   :  { %761 = vadd.xlane.f32.xlu2 %v760_v44  ;;  %v745_v17 = vld [vmem:[#allocation4] sm:$0x1] }
 0x1af   :  { %704 = vadd.xlane.f32.xlu1 %v703_v47 }
 0x1b7   :  { %733 = vadd.xlane.f32.xlu1 %v732_v54 }
 0x221   :  { %v762_v42 = vpop.xlane.xlu2 %761 }
 0x222   :  { %v763_v51 = vrot.slane %v762_v42, 4  ;;  %v705_v56 = vpop.xlane.xlu1 %704 }
 0x223   :  { %v706_v57 = vrot.slane %v705_v56, 4 }
 0x224   :  { %v764_v59 = vadd.f32 %v763_v51, %v762_v42 }
 0x225   :  { %v707_v58 = vadd.f32 %v706_v57, %v705_v56 }
 0x226   :  { %v765_v62 = vrot.slane %v764_v59, 2 }
 0x227   :  { %v708_v60 = vrot.slane %v707_v58, 2 }
 0x228   :  { %v766_v4 = vadd.f32 %v765_v62, %v764_v59 }
 0x229   :  { %v709_v61 = vadd.f32 %v708_v60, %v707_v58 }
 0x22a   :  { %v734_v63 = vpop.xlane.xlu1 %733  ;;  %v767_v7 = vrot.slane %v766_v4, 1 }
 0x22b   :  { %v735_v0 = vrot.slane %v734_v63, 4  ;;  %v710_v1 = vrot.slane %v709_v61, 1 }
 0x22c   :  { %v768_v10 = vadd.f32 %v767_v7, %v766_v4 }
 0x22d   :  { %v736_v2 = vadd.f32 %v735_v0, %v734_v63  ;;  %v711_v3 = vadd.f32 %v710_v1, %v709_v61 }
 0x22f   :  { %v737_v5 = vrot.slane %v736_v2, 2  ;;  %820 = vpush %v711_v3 }
 0x231   :  { %v738_v6 = vadd.f32 %v737_v5, %v736_v2 }
 0x233   :  { %v739_v8 = vrot.slane %v738_v6, 1 }
 0x235   :  { %v740_v9 = vadd.f32 %v739_v8, %v738_v6 }
 0x237   :  { %822 = vpush %v740_v9 }
 0x238   :  { %824 = vpush %v768_v10 }
 0x260   :  { %s821_s0 = spop %820 }
 0x261   :  { %v713_v14 = vstv %s821_s0 }
 0x262   :  { %v714_v15 = vadd.f32 %v713_v14, %v688_v11 }
 0x264   :  { %716 = vst.msk [vmem:[#allocation2] sm:$0x1] %vm648_vm0, %v714_v15 }
 0x268   :  { %s823_s2 = spop %822 }
 0x269   :  { %v742_v18 = vstv %s823_s2  ;;  %s825_s28 = spop %824 }
 0x26a   :  { %v743_v12 = vadd.f32 %v742_v18, %v717_v16  ;;  %v770_v13 = vstv %s825_s28 }
 0x26b   :  { %v771_v19 = vadd.f32 %v770_v13, %v745_v17  ;;  %v776_v33 = vld [vmem:[#allocation2] sm:$0x1] }
 0x26c   :  { %744 = vst.msk [vmem:[#allocation3] sm:$0x1] %vm648_vm0, %v743_v12 }
 0x26d   :  { %772 = vst.msk [vmem:[#allocation4] sm:$0x1] %vm648_vm0, %v771_v19 }
 0x273   :  { %v777_v20 = vld [vmem:[#allocation3] sm:$0x1] }
 0x274   :  { %833 = vrsqrt.f32 %v777_v20  ;;  %v789_v21 = vld [vmem:[#allocation4] sm:$0x1]  ;;  %vm784_vm2 = vweird.f32 %v777_v20 }
 0x275   :  { %835 = vrsqrt.f32 %v789_v21  ;;  %vm796_vm5 = vweird.f32 %v789_v21 }
 0x27a   :  { %v834_v22 = vpop.eup %833 }
 0x27b   :  { %v836_v52 = vpop.eup %835  ;;  %v779_v23 = vmul.f32 %v834_v22, %v777_v20  ;;  %vm785_vm1 = vweird.f32 %v834_v22 }
 0x27c   :  { %v791_v53 = vmul.f32 %v836_v52, %v789_v21  ;;  %vm797_vm3 = vweird.f32 %v836_v52  ;;  %vm786_vm4 = vmor %vm784_vm2, %vm785_vm1 }
 0x27d   :  { %v780_v24 = vmul.f32 %v834_v22, %v779_v23  ;;  %vm798_vm6 = vmor %vm796_vm5, %vm797_vm3 }
 0x27e   :  { %v792_v25 = vmul.f32 %v836_v52, %v791_v53 }
 0x27f   :  { %v781_v26 = vmul.f32 0.5, %v780_v24 }
 0x280   :  { %v793_v27 = vmul.f32 0.5, %v792_v25 }
 0x281   :  { %v782_v29 = vsub.f32 1.5, %v781_v26 }
 0x282   :  { %v794_v30 = vsub.f32 1.5, %v793_v27 }
 0x283   :  { %v783_v31 = vmul.f32 %v834_v22, %v782_v29 }
 0x284   :  { %v795_v32 = vmul.f32 %v836_v52, %v794_v30 }
 0x285   :  { %v787_v35 = vsel %vm786_vm4, %v834_v22, %v783_v31 }
 0x286   :  { %v788_v37 = vmul.f32 %v787_v35, %v776_v33  ;;  %v799_v38 = vsel %vm798_vm6, %v836_v52, %v795_v32 }
 0x288   :  { %v800_v28 = vmul.f32 %v799_v38, %v788_v37 }
 0x28a   :  { %801 = vst.msk [vmem:[#allocation11] sm:$0x1] %vm648_vm0, %v800_v28 }
 0x28b   :  { %812 = dma.vmem_to_hbm [thread:$0]  %s808_s30, 16, %s810_s6, [#allocation7]  }
 0x28c   :  { %937 = dma.done.wait [#allocation7], 16  }
 0x28d   :  { %938 = vsyncadd [#allocation7], 4294967280 }
 0x28e   :  { %817 = vsyncpa [#allocation6], 1 }
 0x28f   :  { %818 = vsyncpa [#allocation9], 1 }
 0x290   :  { %819 = vsyncpa [#allocation7], 1 }

</bundles_post_ra>
